<compile_context>
chip_gen: v7x
topology: tpu7x:2x2x1
jax: 0.10.0
libtpu: 0.0.40
codegen_flags: <defaults>
</compile_context>

<pallas_src>
import math

import jax
import jax.numpy as jnp
from jax.experimental import pallas as pl
from jax.experimental.pallas import tpu as pltpu


def _add_pe_kernel(x_ref, pe_ref, o_ref):
    # x_ref / o_ref: (bT, tR, C); pe_ref: (tR, C). Broadcast over the leading
    # (batch) dim is a cheap VPU op; the kernel is HBM-bound anyway.
    o_ref[...] = x_ref[...] + pe_ref[...][None, :, :]


def make_positional_encoding(d_model: int, max_seq_length: int = 100) -> jnp.ndarray:
    """Build the (max_seq_length, d_model) sin/cos PE table (plain JAX glue).

    Handles odd d_model: the cos half only has floor(d_model/2) columns.
    """
    position = jnp.arange(0, max_seq_length, dtype=jnp.float32)[:, None]          # (L, 1)
    div_term = jnp.exp(
        jnp.arange(0, d_model, 2, dtype=jnp.float32) * (-math.log(10000.0) / d_model)
    )                                                                              # (ceil(D/2),)
    angles = position * div_term                                                   # (L, ceil(D/2))
    pe = jnp.zeros((max_seq_length, d_model), dtype=jnp.float32)
    pe = pe.at[:, 0::2].set(jnp.sin(angles))
    pe = pe.at[:, 1::2].set(jnp.cos(angles[:, : d_model // 2]))
    return pe


def _lane_dense_view(S: int, D: int) -> tuple[int, int]:
    """Pick a row-major (rows, cols) view of the (S, D) slab whose last dim is a
    multiple of 128 when possible (lane-dense => unmasked stores). The reshape is
    row-major so the elementwise add semantics are unchanged."""
    if D % 128 == 0:
        return S, D
    total = S * D
    if total % 128 == 0:
        for cols in (2048, 1024, 512, 256, 128):
            if total % cols == 0:
                return total // cols, cols
    # Fallback: sub-128 lane width -> masked stores, still correct.
    # TODO(synk): could pad D up to the next multiple of 128 for odd d_model,
    # but padding costs an extra full HBM pass in the wrapper; skipped.
    return S, D


def _sublane_multiple(dtype) -> int:
    """Dtype-native sublane multiple: 8 for f32, 16 for bf16, 32 for int8/fp8."""
    return max(8, 32 // jnp.dtype(dtype).itemsize)


def _pick_tiles(B: int, R: int, C: int, itemsize: int, sub: int,
                target_bytes: int = 4 << 20) -> tuple[int, int]:
    """Choose (batch_tile, row_tile) so one block is ~target_bytes.

    Folding batches into the block is the key move: with max_seq_length=100 the
    per-batch slab is often < 0.5 MiB, and per-step fixed overhead (~0.35 us)
    would otherwise dominate on v6e/v7x."""
    row_bytes = C * itemsize
    # Case 1: whole tensor fits in one block.
    if B * R * row_bytes <= target_bytes:
        return B, R
    # Case 2: one full (R, C) slab fits; fold several batches per block.
    if R * row_bytes <= target_bytes:
        bT = max(1, min(B, target_bytes // (R * row_bytes)))
        return bT, R
    # Case 3: tile rows within a single batch; tR a multiple of the sublane
    # group (or the full extent).
    budget_rows = max(1, target_bytes // row_bytes)
    max_rows = (min(R, budget_rows) // sub) * sub
    if max_rows < sub:
        return 1, R  # degenerate (huge C): take the full row extent
    for t in range(max_rows, sub - 1, -sub):
        if R % t == 0:
            return 1, t
    return 1, max_rows  # non-dividing: Pallas masks the partial final block


def positional_encoding_forward(x: jnp.ndarray, pe: jnp.ndarray) -> jnp.ndarray:
    """x: (B, S, D); pe: (max_seq_length, D). Returns x + pe[None, :S, :]."""
    B, S, D = x.shape
    max_len = pe.shape[0]
    assert S <= max_len, f"sequence length {S} exceeds max_seq_length {max_len}"

    # Explicit dtype handling outside the kernel. Note: result dtype == x.dtype
    # (PyTorch would promote bf16 x + f32 pe to f32); acceptable by design.
    pe_slice = pe[:S, :].astype(x.dtype)

    R, C = _lane_dense_view(S, D)
    x2 = x.reshape(B, R, C)          # free row-major view
    pe2 = pe_slice.reshape(R, C)

    sub = _sublane_multiple(x.dtype)
    bT, tR = _pick_tiles(B, R, C, jnp.dtype(x.dtype).itemsize, sub)

    # Row tiles outer, batch tiles inner: pe's block index is constant along the
    # inner axis, so its HBM read is amortized across the batch loop.
    grid = (pl.cdiv(R, tR), pl.cdiv(B, bT))

    out = pl.pallas_call(
        _add_pe_kernel,
        out_shape=jax.ShapeDtypeStruct((B, R, C), x.dtype),
        grid=grid,
        in_specs=[
            pl.BlockSpec((bT, tR, C), lambda r, b: (b, r, 0)),
            pl.BlockSpec((tR, C), lambda r, b: (r, 0)),
        ],
        out_specs=pl.BlockSpec((bT, tR, C), lambda r, b: (b, r, 0)),
        compiler_params=pltpu.CompilerParams(
            # Both axes are independent; on megacore parts the compiler may
            # shard either across TensorCores.
            dimension_semantics=("parallel", "parallel"),
            # ~4 MiB blocks * 2 streams * 2 buffers + pe ~= 17 MiB; 48 MiB limit
            # leaves headroom on every generation (v7x physical VMEM is 64 MiB).
            vmem_limit_bytes=48 << 20,
        ),
    )(x2, pe2)

    return out.reshape(B, S, D)


if __name__ == "__main__":
    max_seq_length = 100
    key = jax.random.PRNGKey(0)

    # Primary small-shape check (B=2, S=8, D=32).
    B, S, D = 2, 8, 32
    x = jax.random.normal(key, (B, S, D), dtype=jnp.float32)
    pe = make_positional_encoding(D, max_seq_length)
    out = jax.block_until_ready(positional_encoding_forward(x, pe))
    ref = x + pe[None, :S, :]
    assert out.shape == (B, S, D)
    assert jnp.allclose(out, ref, atol=1e-6), "mismatch vs reference (f32)"

    # Secondary check: non-128-multiple d_model and full max_seq_length.
    B2, S2, D2 = 3, 100, 48
    x2 = jax.random.normal(jax.random.PRNGKey(1), (B2, S2, D2), dtype=jnp.float32)
    pe2 = make_positional_encoding(D2, max_seq_length)
    out2 = jax.block_until_ready(positional_encoding_forward(x2, pe2))
    ref2 = x2 + pe2[None, :S2, :]
    assert jnp.allclose(out2, ref2, atol=1e-6), "mismatch vs reference (odd view)"

    print("KERNEL_OK")
</pallas_src>

<mosaic_0001>
module attributes {stable_mosaic.version = 11 : i64} {
  func.func @_add_pe_kernel(%arg0: i32, %arg1: i32, %arg2: memref<2x1x256xf32, #tpu.memory_space<vmem>>, %arg3: memref<1x256xf32, #tpu.memory_space<vmem>>, %arg4: memref<2x1x256xf32, #tpu.memory_space<vmem>>) attributes {dimension_semantics = [#tpu.dimension_semantics<parallel>, #tpu.dimension_semantics<parallel>], iteration_bounds = array<i64: 1, 1>, scalar_prefetch = 0 : i64, scratch_operands = 0 : i64, tpu.core_type = #tpu.core_type<tc>, window_params = [{transform_indices = @transform_0, window_bounds = array<i64: 2, 1, 256>}, {transform_indices = @transform_1, window_bounds = array<i64: 1, 256>}, {transform_indices = @transform_2, window_bounds = array<i64: 2, 1, 256>}]} {
    %c0 = arith.constant 0 : index
    %c0_0 = arith.constant 0 : index
    %c0_1 = arith.constant 0 : index
    %0 = vector.load %arg2[%c0, %c0_0, %c0_1] : memref<2x1x256xf32, #tpu.memory_space<vmem>>, vector<2x1x256xf32>
    %c0_2 = arith.constant 0 : index
    %c0_3 = arith.constant 0 : index
    %1 = vector.load %arg3[%c0_2, %c0_3] : memref<1x256xf32, #tpu.memory_space<vmem>>, vector<1x256xf32>
    %2 = vector.shape_cast %1 : vector<1x256xf32> to vector<1x1x256xf32>
    %3 = vector.broadcast %2 : vector<1x1x256xf32> to vector<2x1x256xf32>
    %4 = arith.addf %0, %3 : vector<2x1x256xf32>
    %c0_4 = arith.constant 0 : index
    %c0_5 = arith.constant 0 : index
    %c0_6 = arith.constant 0 : index
    %5 = vector.load %arg4[%c0_4, %c0_5, %c0_6] : memref<2x1x256xf32, #tpu.memory_space<vmem>>, vector<2x1x256xf32>
    tpu.vector_store %arg4[%c0_4, %c0_5, %c0_6], %4 {strides = array<i32>} : memref<2x1x256xf32, #tpu.memory_space<vmem>>, vector<2x1x256xf32>,
    return
  }
  func.func @transform_0(%arg0: i32, %arg1: i32) -> (i32, i32, i32) {
    %c0_i32 = arith.constant 0 : i32
    %c0_i32_0 = arith.constant 0 : i32
    return %arg1, %arg0, %c0_i32 : i32, i32, i32
  }
  func.func @transform_1(%arg0: i32, %arg1: i32) -> (i32, i32) {
    %c0_i32 = arith.constant 0 : i32
    %c0_i32_0 = arith.constant 0 : i32
    return %arg0, %c0_i32 : i32, i32
  }
  func.func @transform_2(%arg0: i32, %arg1: i32) -> (i32, i32, i32) {
    %c0_i32 = arith.constant 0 : i32
    %c0_i32_0 = arith.constant 0 : i32
    return %arg1, %arg0, %c0_i32 : i32, i32, i32
  }
}

</mosaic_0001>

<bundles_post_ra>
// kernel: tpu_custom_call.1
= control target key start
LH: loop header
LB: loop body
LE: loop exit
PB: predicated region body
PF: predicated region fallthrough
CT: control target
= control target key end

     0   :  { %7 = vsyncpa [#allocation3], 0  ;;  %s158_s0 = inlined_call_operand.hbm [shape: f32[2,1,256], index: 0, kind: input, shape index: {}]   ;;  %s159_s1 = inlined_call_operand.vmem [shape: f32[1,256], index: 1, kind: input, shape index: {}]   ;;  %s160_s2 = inlined_call_operand.hbm [shape: f32[2,1,256], index: 2, kind: output, shape index: {}]  }
   0x1   :  { %8 = vsyncpa [#allocation4], 0  ;;  %s106_s9 = smov [#allocation2]   ;;  %s58_s13 = scalar_lea.hbm %s158_s0, 64 }
   0x2   :  { %s14_s10 = sshll.u32 %s106_s9, 4  ;;  %p59_p0 = scmp.ne.s32.totalorder %s158_s0, %s58_s13  ;;  %s15_s10 = int_to_ptr.vmem [resolvable:$true] %s14_s10 }
   0x3   :  { %p62_p1 = scmp.lt.u32.totalorder %s58_s13, %s158_s0 }
   0x5   :  { %p64_p2 = pnand %p62_p1, %p59_p0 }
   0x7   :  { %67 = shalt.err (!%p64_p2)
}
   0x8   :  { %s68_s18 = scalar_lea.vmem %s15_s10, 64  ;;  %p73_p4 = scmp.lt.s32.totalorder %s15_s10, %s15_s10 }
   0x9   :  { %p69_p3 = scmp.ne.s32.totalorder %s15_s10, %s68_s18  ;;  %p74_p5 = scmp.lt.s32.totalorder %s68_s18, %s68_s18 }
   0xb   :  { %p75_p6 = por %p74_p5, %p73_p4 }
   0xd   :  { %p76_p7 = pnand %p75_p6, %p69_p3 }
   0xf   :  { %79 = shalt.err (!%p76_p7)
}
  0x10   :  { %s107_s19 = smov 32   ;;  %s108_s20 = smov 2  }
  0x11   :  { %20 = dma.hbm_to_vmem [thread:$0]  %s158_s0, 64, %s15_s10, [#allocation3], %s107_s19, %s107_s19, %s108_s20  }
  0x12   :  { %102 = dma.done.wait [#allocation3], 64  }
  0x13   :  { %103 = vsyncadd [#allocation3], 4294967232  ;;  %v31_v0 = vlaneseq  ;;  %s109_s23 = smov [#allocation5]   ;;  %v26_v1 = vld [vmem:[#allocation2] sm:$0x3] }
  0x14   :  { %s42_s24 = sshll.u32 %s109_s23, 4  ;;  %v28_v2 = vld [vmem:[%s159_s1] sm:$0x3]  ;;  %v27_v3 = vld [vmem:[#allocation2 + $0x2] sm:$0x3]  ;;  %s43_s24 = int_to_ptr.vmem [resolvable:$true] %s42_s24 }
  0x15   :  { %vm33_vm0 = vcmp.lt.s32.totalorder %v31_v0, 256  ;;  %v29_v4 = vadd.f32 %v28_v2, %v26_v1  ;;  %v30_v5 = vadd.f32 %v28_v2, %v27_v3  ;;  %s80_s27 = scalar_lea.vmem %s43_s24, 64  ;;  %p85_p9 = scmp.lt.s32.totalorder %s43_s24, %s43_s24 }
  0x16   :  { %p81_p8 = scmp.ne.s32.totalorder %s43_s24, %s80_s27  ;;  %p86_p10 = scmp.lt.s32.totalorder %s80_s27, %s80_s27 }
  0x17   :  { %35 = vst.msk [vmem:[#allocation5] sm:$0x3] %vm33_vm0, %v29_v4  ;;  %36 = vst.msk [vmem:[#allocation5 + $0x2] sm:$0x3] %vm33_vm0, %v30_v5 }
  0x18   :  { %p87_p11 = por %p86_p10, %p85_p9 }
  0x1a   :  { %p88_p12 = pnand %p87_p11, %p81_p8 }
  0x1c   :  { %91 = shalt.err (!%p88_p12)
}
  0x1d   :  { %s92_s29 = scalar_lea.hbm %s160_s2, 64 }
  0x1e   :  { %p93_p13 = scmp.ne.s32.totalorder %s160_s2, %s92_s29  ;;  %p96_p0 = scmp.lt.u32.totalorder %s92_s29, %s160_s2 }
  0x20   :  { %p98_p1 = pnand %p96_p0, %p93_p13 }
  0x22   :  { %101 = shalt.err (!%p98_p1)
}
  0x23   :  { %48 = dma.vmem_to_hbm [thread:$0]  %s43_s24, 64, %s160_s2, [#allocation4], %s107_s19, %s107_s19, %s108_s20  }
  0x24   :  { %104 = dma.done.wait [#allocation4], 64  }
  0x25   :  { %105 = vsyncadd [#allocation4], 4294967232 }
  0x26   :  { %52 = vsyncpa [#allocation3], 1 }
  0x27   :  { %53 = vsyncpa [#allocation4], 1 }

</bundles_post_ra>
